<compile_context>
chip_gen: v7x
topology: tpu7x:2x2x1
jax: 0.10.0
libtpu: 0.0.40
codegen_flags: <defaults>
</compile_context>

<pallas_src>
import functools

import jax
import jax.numpy as jnp
from jax.experimental import pallas as pl
from jax.experimental.pallas import tpu as pltpu


def _round_up(x, m):
    return ((x + m - 1) // m) * m


def _answer_decoder_kernel_fused_acc(p_ref, q_ref, w_ref, b_ref, o_ref, *, n_kp):
    """f32 output: accumulate directly into the resident (tm, tn) output block."""
    k = pl.program_id(2)

    @pl.when(k == 0)
    def _init():
        # Fold the bias into the accumulator init (saves a separate VPU pass).
        o_ref[...] = jnp.broadcast_to(b_ref[...], o_ref.shape)

    @pl.when(k < n_kp)
    def _p_part():
        o_ref[...] += jnp.dot(p_ref[...], w_ref[...],
                              preferred_element_type=jnp.float32)

    @pl.when(k >= n_kp)
    def _q_part():
        o_ref[...] += jnp.dot(q_ref[...], w_ref[...],
                              preferred_element_type=jnp.float32)


def _answer_decoder_kernel_scratch(p_ref, q_ref, w_ref, b_ref, o_ref, acc_ref, *, n_kp):
    """Non-f32 output: accumulate in an f32 VMEM scratch, cast + store on last k."""
    k = pl.program_id(2)

    @pl.when(k == 0)
    def _init():
        acc_ref[...] = jnp.broadcast_to(b_ref[...], acc_ref.shape)

    @pl.when(k < n_kp)
    def _p_part():
        acc_ref[...] += jnp.dot(p_ref[...], w_ref[...],
                                preferred_element_type=jnp.float32)

    @pl.when(k >= n_kp)
    def _q_part():
        acc_ref[...] += jnp.dot(q_ref[...], w_ref[...],
                                preferred_element_type=jnp.float32)

    @pl.when(k == pl.num_programs(2) - 1)
    def _finalize():
        o_ref[...] = acc_ref[...].astype(o_ref.dtype)


def prepare_answer_decoder_params(weight, bias, d_p, d_q, *, tk=512, tn=512,
                                  param_dtype=None):
    """One-time parameter prep: transpose, split-aware zero-pad, lane-dense out dim.

    weight: (out_dim, hidden) PyTorch nn.Linear layout, hidden == d_p + d_q
    bias:   (out_dim,)
    param_dtype: e.g. jnp.bfloat16 for bf16 compute / f32 accumulate (recommended
                 on v5e; pair with tk=1024 for deeper K passes).
    """
    out_dim, hidden = weight.shape
    assert hidden == d_p + d_q, "hidden_dim must equal D_p + D_q"

    # K tile: validated multiple of 128, chosen from the LARGER of the two regions;
    # the smaller region is zero-padded up to tk (cheap zero MACs) instead of
    # dragging the whole K loop down to its width.
    tk = _round_up(max(int(tk), 128), 128)
    tk_eff = min(tk, _round_up(max(d_p, d_q), 128))
    d_p_pad = _round_up(d_p, tk_eff)
    d_q_pad = _round_up(d_q, tk_eff)

    # N tile: multiple of 256 (full v6e/v7x MXU width; lane-dense stores everywhere),
    # and out_dim is padded up to a whole number of N tiles so awkward sizes never
    # collapse the tile.
    tn = _round_up(max(int(tn), 256), 256)
    tn_eff = min(tn, _round_up(out_dim, 256))
    out_pad = _round_up(out_dim, tn_eff)

    w_dtype = weight.dtype if param_dtype is None else jnp.dtype(param_dtype)
    w_t = jnp.swapaxes(weight, 0, 1).astype(w_dtype)      # (hidden, out) once, at init
    w_pad = jnp.zeros((d_p_pad + d_q_pad, out_pad), dtype=w_dtype)
    w_pad = w_pad.at[:d_p, :out_dim].set(w_t[:d_p])
    w_pad = w_pad.at[d_p_pad:d_p_pad + d_q, :out_dim].set(w_t[d_p:])

    # Bias stays f32 (accumulation / epilogue precision; v5e has no bf16 VPU).
    b_pad = jnp.zeros((1, out_pad), jnp.float32).at[0, :out_dim].set(
        bias.astype(jnp.float32))

    return dict(w=w_pad, b=b_pad, d_p=d_p, d_q=d_q,
                d_p_pad=d_p_pad, d_q_pad=d_q_pad,
                out_dim=out_dim, out_pad=out_pad,
                tk=tk_eff, tn=tn_eff)


def answer_decoder_forward(encoded_paragraph, encoded_question, params, *, tm=512):
    """Equivalent of AnswerDecoder.forward: Linear(cat([p, q], dim=1))."""
    p, q = encoded_paragraph, encoded_question
    B, d_p = p.shape
    Bq, d_q = q.shape
    assert B == Bq
    assert d_p == params["d_p"] and d_q == params["d_q"]

    w, b = params["w"], params["b"]
    d_p_pad, d_q_pad = params["d_p_pad"], params["d_q_pad"]
    out_dim, out_pad = params["out_dim"], params["out_pad"]
    tk, tn_eff = params["tk"], params["tn"]

    compute_dtype = w.dtype
    out_dtype = encoded_paragraph.dtype

    # M tile: multiple of the 8-row sublane quantum; B is padded up to a whole
    # number of M tiles (no divisibility-driven tile collapse).
    tm_eff = max(8, min(_round_up(int(tm), 8), _round_up(B, 8)))
    B_pad = _round_up(B, tm_eff)
    grid_m = B_pad // tm_eff
    grid_n = out_pad // tn_eff

    # v7x: make sure there are >= 2 (M, N) tiles so dimension_semantics can shard
    # across the two TensorCores (only when the halved tile stays a 256-multiple).
    if grid_m * grid_n == 1 and tn_eff % 512 == 0:
        tn_eff //= 2
        grid_n = out_pad // tn_eff

    n_kp = d_p_pad // tk
    n_kq = d_q_pad // tk
    grid = (grid_m, grid_n, n_kp + n_kq)

    # One-time cast to the compute dtype + zero-pad to the tile grid in the wrapper
    # (not per-K-step inside the kernel).
    p = p.astype(compute_dtype)
    q = q.astype(compute_dtype)
    if p.shape != (B_pad, d_p_pad):
        p = jnp.pad(p, ((0, B_pad - B), (0, d_p_pad - d_p)))
    if q.shape != (B_pad, d_q_pad):
        q = jnp.pad(q, ((0, B_pad - B), (0, d_q_pad - d_q)))

    def _nbytes(a):
        return a.size * a.dtype.itemsize

    out_bytes = B_pad * out_pad * jnp.dtype(out_dtype).itemsize
    cost = pl.CostEstimate(
        flops=2 * B_pad * (d_p_pad + d_q_pad) * out_pad,
        transcendentals=0,
        bytes_accessed=int(grid_n * (_nbytes(p) + _nbytes(q))   # p/q re-read per N tile
                           + grid_m * _nbytes(w)                # w re-read per M tile
                           + grid_m * grid_n * tn_eff * 4       # bias tile per (i, j)
                           + out_bytes),                        # output written once
    )

    in_specs = [
        # p's block index is frozen at its last K tile while the q region runs (and
        # vice versa) -> the pipeliner keeps the resident buffer, no redundant DMAs.
        pl.BlockSpec((tm_eff, tk), lambda i, j, k: (i, jnp.minimum(k, n_kp - 1))),
        pl.BlockSpec((tm_eff, tk), lambda i, j, k: (i, jnp.maximum(k - n_kp, 0))),
        pl.BlockSpec((tk, tn_eff), lambda i, j, k: (k, j)),
        pl.BlockSpec((1, tn_eff), lambda i, j, k: (0, j)),
    ]
    out_spec = pl.BlockSpec((tm_eff, tn_eff), lambda i, j, k: (i, j))

    if jnp.dtype(out_dtype) == jnp.float32:
        # Output block is resident across K (its index map ignores k): accumulate
        # into it directly, no scratch, no finalize copy.
        kernel = functools.partial(_answer_decoder_kernel_fused_acc, n_kp=n_kp)
        scratch_shapes = []
    else:
        kernel = functools.partial(_answer_decoder_kernel_scratch, n_kp=n_kp)
        scratch_shapes = [pltpu.VMEM((tm_eff, tn_eff), jnp.float32)]

    out = pl.pallas_call(
        kernel,
        out_shape=jax.ShapeDtypeStruct((B_pad, out_pad), out_dtype),
        grid_spec=pltpu.PrefetchScalarGridSpec(
            num_scalar_prefetch=0,
            grid=grid,
            in_specs=in_specs,
            out_specs=out_spec,
            scratch_shapes=scratch_shapes,
        ),
        compiler_params=pltpu.CompilerParams(
            dimension_semantics=("parallel", "parallel", "arbitrary"),
            vmem_limit_bytes=32 * 1024 * 1024,
        ),
        cost_estimate=cost,
    )(p, q, w, b)

    # Strip batch / lane padding.
    return out[:B, :out_dim]


if __name__ == "__main__":
    # Small shapes consistent with the module:
    #   batch=2, D_p=16, D_q=16 -> hidden_dim=32, output_dim=8
    B, D_P, D_Q, OUT = 2, 16, 16, 8
    HIDDEN = D_P + D_Q

    key = jax.random.PRNGKey(0)
    k_p, k_q, k_w, k_b = jax.random.split(key, 4)

    encoded_paragraph = jax.random.normal(k_p, (B, D_P), dtype=jnp.float32)
    encoded_question = jax.random.normal(k_q, (B, D_Q), dtype=jnp.float32)

    # Deterministic nn.Linear-style init: U(-1/sqrt(hidden_dim), 1/sqrt(hidden_dim))
    bound = 1.0 / (HIDDEN ** 0.5)
    weight = jax.random.uniform(k_w, (OUT, HIDDEN), jnp.float32, -bound, bound)
    bias = jax.random.uniform(k_b, (OUT,), jnp.float32, -bound, bound)

    # One-time parameter prep (transpose + pad), then the per-call kernel.
    params = prepare_answer_decoder_params(weight, bias, D_P, D_Q)
    out = answer_decoder_forward(encoded_paragraph, encoded_question, params)
    out = jax.block_until_ready(out)

    # Reference (pure JAX) check of concat + linear semantics.
    combined = jnp.concatenate([encoded_paragraph, encoded_question], axis=1)
    ref = combined @ weight.T + bias
    assert out.shape == (B, OUT)
    assert jnp.allclose(out, ref, atol=1e-5, rtol=1e-5), "mismatch vs reference"

    print("KERNEL_OK")
</pallas_src>

<mosaic_0001>
module attributes {stable_mosaic.version = 11 : i64} {
  func.func @_answer_decoder_kernel_fused_acc(%arg0: i32, %arg1: i32, %arg2: i32, %arg3: memref<8x128xf32, #tpu.memory_space<vmem>>, %arg4: memref<8x128xf32, #tpu.memory_space<vmem>>, %arg5: memref<128x256xf32, #tpu.memory_space<vmem>>, %arg6: memref<1x256xf32, #tpu.memory_space<vmem>>, %arg7: memref<8x256xf32, #tpu.memory_space<vmem>>) attributes {dimension_semantics = [#tpu.dimension_semantics<parallel>, #tpu.dimension_semantics<parallel>, #tpu.dimension_semantics<arbitrary>], iteration_bounds = array<i64: 1, 1, 2>, scalar_prefetch = 0 : i64, scratch_operands = 0 : i64, tpu.core_type = #tpu.core_type<tc>, window_params = [{transform_indices = @transform_0, window_bounds = array<i64: 8, 128>}, {transform_indices = @transform_1, window_bounds = array<i64: 8, 128>}, {transform_indices = @transform_2, window_bounds = array<i64: 128, 256>}, {transform_indices = @transform_3, window_bounds = array<i64: 1, 256>}, {transform_indices = @transform_4, window_bounds = array<i64: 8, 256>}]} {
    %c0_i32 = arith.constant 0 : i32
    %0 = arith.cmpi eq, %arg2, %c0_i32 : i32
    %1 = arith.extui %0 : i1 to i32
    %c0_i32_0 = arith.constant 0 : i32
    %2 = arith.cmpi ne, %1, %c0_i32_0 : i32
    scf.if %2 {
      %c0 = arith.constant 0 : index
      %c0_4 = arith.constant 0 : index
      %9 = vector.load %arg6[%c0, %c0_4] : memref<1x256xf32, #tpu.memory_space<vmem>>, vector<1x256xf32>
      %10 = vector.shape_cast %9 : vector<1x256xf32> to vector<1x256xf32>
      %11 = vector.broadcast %10 : vector<1x256xf32> to vector<8x256xf32>
      %c0_5 = arith.constant 0 : index
      %c0_6 = arith.constant 0 : index
      %12 = vector.load %arg7[%c0_5, %c0_6] : memref<8x256xf32, #tpu.memory_space<vmem>>, vector<8x256xf32>
      tpu.vector_store %arg7[%c0_5, %c0_6], %11 {strides = array<i32>} : memref<8x256xf32, #tpu.memory_space<vmem>>, vector<8x256xf32>,
    } else {
    }
    %c1_i32 = arith.constant 1 : i32
    %3 = arith.cmpi slt, %arg2, %c1_i32 : i32
    %4 = arith.extui %3 : i1 to i32
    %c0_i32_1 = arith.constant 0 : i32
    %5 = arith.cmpi ne, %4, %c0_i32_1 : i32
    scf.if %5 {
      %c0 = arith.constant 0 : index
      %c0_4 = arith.constant 0 : index
      %9 = vector.load %arg7[%c0, %c0_4] : memref<8x256xf32, #tpu.memory_space<vmem>>, vector<8x256xf32>
      %c0_5 = arith.constant 0 : index
      %c0_6 = arith.constant 0 : index
      %10 = vector.load %arg3[%c0_5, %c0_6] : memref<8x128xf32, #tpu.memory_space<vmem>>, vector<8x128xf32>
      %c0_7 = arith.constant 0 : index
      %c0_8 = arith.constant 0 : index
      %11 = vector.load %arg5[%c0_7, %c0_8] : memref<128x256xf32, #tpu.memory_space<vmem>>, vector<128x256xf32>
      %cst = arith.constant dense<0.000000e+00> : vector<8x256xf32>
      %12 = tpu.matmul %10, %11, %cst {dimension_numbers = #tpu.dot_dimension_numbers<[1], [0], [0], [1], [0, 0, 1, 1], [], []>} : vector<8x128xf32>, vector<128x256xf32>, vector<8x256xf32> -> vector<8x256xf32>
      %13 = arith.addf %9, %12 : vector<8x256xf32>
      %c0_9 = arith.constant 0 : index
      %c0_10 = arith.constant 0 : index
      %14 = vector.load %arg7[%c0_9, %c0_10] : memref<8x256xf32, #tpu.memory_space<vmem>>, vector<8x256xf32>
      tpu.vector_store %arg7[%c0_9, %c0_10], %13 {strides = array<i32>} : memref<8x256xf32, #tpu.memory_space<vmem>>, vector<8x256xf32>,
    } else {
    }
    %c1_i32_2 = arith.constant 1 : i32
    %6 = arith.cmpi sge, %arg2, %c1_i32_2 : i32
    %7 = arith.extui %6 : i1 to i32
    %c0_i32_3 = arith.constant 0 : i32
    %8 = arith.cmpi ne, %7, %c0_i32_3 : i32
    scf.if %8 {
      %c0 = arith.constant 0 : index
      %c0_4 = arith.constant 0 : index
      %9 = vector.load %arg7[%c0, %c0_4] : memref<8x256xf32, #tpu.memory_space<vmem>>, vector<8x256xf32>
      %c0_5 = arith.constant 0 : index
      %c0_6 = arith.constant 0 : index
      %10 = vector.load %arg4[%c0_5, %c0_6] : memref<8x128xf32, #tpu.memory_space<vmem>>, vector<8x128xf32>
      %c0_7 = arith.constant 0 : index
      %c0_8 = arith.constant 0 : index
      %11 = vector.load %arg5[%c0_7, %c0_8] : memref<128x256xf32, #tpu.memory_space<vmem>>, vector<128x256xf32>
      %cst = arith.constant dense<0.000000e+00> : vector<8x256xf32>
      %12 = tpu.matmul %10, %11, %cst {dimension_numbers = #tpu.dot_dimension_numbers<[1], [0], [0], [1], [0, 0, 1, 1], [], []>} : vector<8x128xf32>, vector<128x256xf32>, vector<8x256xf32> -> vector<8x256xf32>
      %13 = arith.addf %9, %12 : vector<8x256xf32>
      %c0_9 = arith.constant 0 : index
      %c0_10 = arith.constant 0 : index
      %14 = vector.load %arg7[%c0_9, %c0_10] : memref<8x256xf32, #tpu.memory_space<vmem>>, vector<8x256xf32>
      tpu.vector_store %arg7[%c0_9, %c0_10], %13 {strides = array<i32>} : memref<8x256xf32, #tpu.memory_space<vmem>>, vector<8x256xf32>,
    } else {
    }
    return
  }
  func.func @transform_0(%arg0: i32, %arg1: i32, %arg2: i32) -> (i32, i32) {
    %c0_i32 = arith.constant 0 : i32
    %0 = arith.minsi %arg2, %c0_i32 : i32
    %c0_i32_0 = arith.constant 0 : i32
    return %arg0, %0 : i32, i32
  }
  func.func @transform_1(%arg0: i32, %arg1: i32, %arg2: i32) -> (i32, i32) {
    %c1_i32 = arith.constant 1 : i32
    %0 = arith.subi %arg2, %c1_i32 : i32
    %c0_i32 = arith.constant 0 : i32
    %1 = arith.maxsi %0, %c0_i32 : i32
    %c0_i32_0 = arith.constant 0 : i32
    return %arg0, %1 : i32, i32
  }
  func.func @transform_2(%arg0: i32, %arg1: i32, %arg2: i32) -> (i32, i32) {
    %c0_i32 = arith.constant 0 : i32
    return %arg2, %arg1 : i32, i32
  }
  func.func @transform_3(%arg0: i32, %arg1: i32, %arg2: i32) -> (i32, i32) {
    %c0_i32 = arith.constant 0 : i32
    %c0_i32_0 = arith.constant 0 : i32
    return %c0_i32, %arg1 : i32, i32
  }
  func.func @transform_4(%arg0: i32, %arg1: i32, %arg2: i32) -> (i32, i32) {
    %c0_i32 = arith.constant 0 : i32
    return %arg0, %arg1 : i32, i32
  }
}

</mosaic_0001>

<bundles_post_ra>
// kernel: tpu_custom_call.1
= control target key start
LH: loop header
LB: loop body
LE: loop exit
PB: predicated region body
PF: predicated region fallthrough
CT: control target
= control target key end

     0   :  { %s1557_s0 = inlined_call_operand.hbm [shape: f32[8,128], index: 0, kind: input, shape index: {}]   ;;  %s1558_s1 = inlined_call_operand.hbm [shape: f32[8,128], index: 1, kind: input, shape index: {}]   ;;  %s1559_s2 = inlined_call_operand.hbm [shape: f32[256,256], index: 2, kind: input, shape index: {}]   ;;  %s1560_s3 = inlined_call_operand.vmem [shape: f32[1,256], index: 3, kind: input, shape index: {}]   ;;  %s1561_s4 = inlined_call_operand.hbm [shape: f32[8,256], index: 4, kind: output, shape index: {}]  }
   0x1   :  { %1571 = sst [smem:[#allocation13_spill]] %s1558_s1 }
   0x2   :  { %9 = vsyncpa [#allocation3], 0 }
   0x3   :  { %11 = vsyncpa [#allocation3 + $0x1], 0 }
   0x4   :  { %12 = vsyncpa [#allocation6], 0 }
   0x5   :  { %14 = vsyncpa [#allocation6 + $0x1], 0 }
   0x6   :  { %15 = vsyncpa [#allocation4], 0  ;;  %s1210_s15 = smov 0   ;;  %s1212_s16 = smov 0  }
   0x7   :  { %s1214_s17 = smov 0   ;;  %s1216_s18 = smov 0  }
   0x8   :  { %s1218_s19 = smov 0   ;;  %s1220_s20 = smov 0  }
   0x9   :  { %s1222_s21 = smov 0   ;;  %s1224_s22 = smov 0  }
   0xa   :  { %s1226_s23 = smov 0   ;;  %s1228_s24 = smov 0  }
   0xb LB: > { %s1257_s25 = sadd.s32 4294967295, %s1175_s24   ;;  %s33_s26 = sadd.s32 1, %s1171_s23  ;;  %s1175_s24 = sphi %s1228_s24, %s21_s24   ;;  %s1171_s23 = sphi %s1226_s23, %s1598_s23   ;;  %s1167_s22 = sphi %s1224_s22, %s1597_s22   ;;  %s1163_s21 = sphi %s1222_s21, %s1547_s21   ;;  %s1159_s20 = sphi %s1220_s20, %s1596_s20   ;;  %s1155_s19 = sphi %s1218_s19, %s1542_s19   ;;  %s1151_s18 = sphi %s1216_s18, %s1595_s18   ;;  %s1147_s17 = sphi %s1214_s17, %s1594_s17   ;;  %s1143_s16 = sphi %s1212_s16, %s1593_s16   ;;  %s1139_s15 = sphi %s1210_s15, %s1592_s15  }
   0xc   : > { %p34_p0 = scmp.ge.s32.totalorder %s33_s26, 2  ;;  %p1564_p1 = scmp.eq.s32.totalorder %s1175_s24, 0 }
   0xd   : > { %p1563_p2 = scmp.eq.s32.totalorder %s1257_s25, 0  ;;  %p1135_p3 = scmp.ne.s32.totalorder %s1155_s19, 0 }
   0xe   : > { %s1600_s26 = smov (%p34_p0, %s33_s26), 0  ;;  %p100_p5 = scmp.ne.s32.totalorder %s1155_s19, %s1151_s18 }
   0xf   : > { %p1267_p4 = por %p1135_p3, %p1564_p1  ;;  %s110_s28 = ssub.s32 %s1171_s23, %s1600_s26 }
  0x10   : > { %p1276_p6 = por %p100_p5, %p1563_p2  ;;  %p113_p7 = scmp.eq.s32.totalorder %s110_s28, 0 }
  0x11   : > { %s115_s30 = sadd.s32 1, %s1147_s17  ;;  %p122_p8 = scmp.ne.s32.totalorder %s1147_s17, %s1143_s16 }
  0x12   : > { %s1573_s29 = scalar_select %p1276_p6, 1, 0 }
  0x13   : > { %s1284_s5 = scalar_select %p113_p7, %s1147_s17, %s115_s30  }
  0x14   : > { %p124_p9 = por %p122_p8, %p1564_p1  ;;  %p128_p10 = scmp.ne.s32.totalorder %s1143_s16, %s1139_s15 }
  0x15   : > { %p1562_p11 = scmp.lt.s32.totalorder %s1175_s24, 2  ;;  %s235_s7 = sand.u32 1, %s1175_s24  }
  0x16   : > { %p1292_p12 = por %p128_p10, %p1563_p2  ;;  %s1177_s8 = smov [#allocation5]  }
  0x17   : > { %s250_s9 = sshll.u32 %s1177_s8, 4  ;;  %p1301_p13 = pnand %p1562_p11, %p1267_p4  ;;  %s251_s9 = int_to_ptr.vmem [resolvable:$true] %s250_s9 }
  0x18   : > { %s1574_s6 = scalar_select %p1292_p12, 1, 0 }
  0x19   : > { %s1575_s10 = scalar_select %p1301_p13, 1, 0 }
  0x1a   : > { %p1307_p0 = pnand %p1562_p11, %p124_p9  ;;  %s1312_s12 = scalar_lea.sflag [#allocation6], %s235_s7 }
  0x1b   : > { %s1577_s1 = sld [smem:[#allocation13_spill]]  ;;  %p957_p5 = pneg %p1301_p13 }
  0x1c   : > { %s1576_s11 = scalar_select %p1307_p0, 1, 0 }
  0x21   : > { %s955_s15 = scalar_lea.hbm %s1577_s1, 128 }
  0x22   : > { %p956_p4 = scmp.ne.s32.totalorder %s1577_s1, %s955_s15  ;;  %p962_p10 = scmp.lt.u32.totalorder %s955_s15, %s955_s15 }
  0x23   : > { %p964_p9 = scmp.lt.u32.totalorder %s955_s15, %s1577_s1 }
  0x24   : > { %p958_p7 = pnand %p957_p5, %p956_p4 }
  0x25   : > { %p965_p11 = por %p964_p9, %p962_p10 }
  0x26   : > { %p959_p8 = pneg %p958_p7 }
  0x28   : > { %p966_p2 = pnand %p965_p11, %p959_p8 }
  0x2a   : > { %969 = shalt.err (!%p966_p2)
}
  0x2b   : > { %s970_s7 = scalar_lea.vmem %s251_s9, 128  ;;  %s977_s8 = scalar_lea.vmem %s251_s9, 256 }
  0x2c   : > { %p971_p1 = scmp.ne.s32.totalorder %s251_s9, %s970_s7  ;;  %p978_p6 = scmp.lt.s32.totalorder %s251_s9, %s251_s9 }
  0x2d   : > { %p979_p0 = scmp.lt.s32.totalorder %s977_s8, %s970_s7 }
  0x2e   : > { %p973_p3 = pnand %p971_p1, %p957_p5 }
  0x2f   : > { %p980_p13 = por %p979_p0, %p978_p6 }
  0x30   : > { %p974_p12 = pneg %p973_p3 }
  0x32   : > { %p981_p4 = pnand %p980_p13, %p974_p12 }
  0x34   : > { %984 = shalt.err (!%p981_p4)
}
  0x35   : > { %p1578_p7 = scmp.ne.s32.totalorder %s1575_s10, 0  ;;  %p279_p1 = scmp.lt.s32.totalorder %s1175_s24, 3 }
  0x36   : > { %p1579_p2 = scmp.ge.s32.totalorder %s1175_s24, 1  ;;  %p1136_p11 = scmp.ne.s32.totalorder %s1163_s21, 0 }
  0x37   : > { %847 = dma.hbm_to_vmem [thread:$0]  (!%p1578_p7), %s1577_s1, 128, %s251_s9, %s1312_s12  }
  0x38   : > { %p1334_p6 = pnand %p1579_p2, %p279_p1  ;;  %p66_p12 = scmp.ne.s32.totalorder %s1163_s21, %s1159_s20 }
  0x39   : > { %p1581_p13 = scmp.eq.s32.totalorder %s1175_s24, 0  ;;  %p1582_p3 = scmp.eq.s32.totalorder %s1257_s25, 0 }
  0x3a   : > { %s1580_s15 = scalar_select %p1334_p6, 1, 0 }
  0x3b   : > { %p62_p0 = por %p1136_p11, %p1581_p13  ;;  %p1345_p5 = por %p1582_p3, %p66_p12 }
  0x3c   : > { %s1178_s18 = smov [#allocation2]   ;;  %p1584_p8 = scmp.lt.s32.totalorder %s1175_s24, 2 }
  0x3d   : > { %s1583_s10 = scalar_select %p1345_p5, 1, 0 }
  0x3e   : > { %s228_s27 = sshll.u32 %s1178_s18, 4  ;;  %p1351_p10 = pnand %p1584_p8, %p62_p0  ;;  %s229_s27 = int_to_ptr.vmem [resolvable:$true] %s228_s27 }
  0x3f   : > { %s259_s28 = sand.u32 1, %s1147_s17   ;;  %s985_s8 = scalar_lea.hbm %s1557_s0, 128 }
  0x40   : > { %s1585_s9 = scalar_select %p1351_p10, 1, 0 }
  0x41   : > { %s750_s30 = sshll.u32 %s259_s28, 8  ;;  %p986_p9 = scmp.ne.s32.totalorder %s1557_s0, %s985_s8 }
  0x42   : > { %p987_p4 = pneg %p1351_p10  ;;  %p992_p2 = scmp.lt.u32.totalorder %s985_s8, %s985_s8 }
  0x43   : > { %p994_p11 = scmp.lt.u32.totalorder %s985_s8, %s1557_s0 }
  0x44   : > { %p988_p7 = pnand %p987_p4, %p986_p9 }
  0x45   : > { %p995_p12 = por %p994_p11, %p992_p2 }
  0x46   : > { %p989_p1 = pneg %p988_p7 }
  0x48   : > { %p996_p13 = pnand %p995_p12, %p989_p1 }
  0x4a   : > { %999 = shalt.err (!%p996_p13)
}
  0x4b   : > { %s1000_s28 = scalar_lea.vmem %s229_s27, 128  ;;  %s1007_s7 = scalar_lea.vmem %s229_s27, 256 }
  0x4c   : > { %p1001_p0 = scmp.ne.s32.totalorder %s229_s27, %s1000_s28  ;;  %p1008_p5 = scmp.lt.s32.totalorder %s229_s27, %s229_s27 }
  0x4d   : > { %p1009_p6 = scmp.lt.s32.totalorder %s1007_s7, %s1000_s28 }
  0x4e   : > { %p1003_p3 = pnand %p1001_p0, %p987_p4 }
  0x4f   : > { %p1010_p10 = por %p1009_p6, %p1008_p5 }
  0x50   : > { %p1004_p8 = pneg %p1003_p3 }
  0x52   : > { %p1011_p9 = pnand %p1010_p10, %p1004_p8 }
  0x54   : > { %1014 = shalt.err (!%p1011_p9)
}
  0x55   : > { %p1586_p7 = scmp.ne.s32.totalorder %s1585_s9, 0  ;;  %s766_s1 = sshll.u32 %s1171_s23, 12 }
  0x56   : > { %s1376_s18 = scalar_lea.hbm %s1559_s2, %s766_s1  ;;  %s261_s28 = scalar_lea.vmem [#allocation7], %s750_s30 }
  0x57   : > { %844 = dma.hbm_to_vmem [thread:$0]  (!%p1586_p7), %s1557_s0, 128, %s229_s27, [#allocation3]  }
  0x58   : > { %s271_s7 = sshll.u32 %s261_s28, 4  ;;  %s1015_s9 = scalar_lea.hbm %s1376_s18, 4096  ;;  %s1378_s7 = int_to_ptr.vmem [resolvable:$true] %s271_s7 }
  0x59   : > { %p1016_p6 = scmp.ne.s32.totalorder %s1376_s18, %s1015_s9  ;;  %p1587_p5 = scmp.ne.s32.totalorder %s1576_s11, 0 }
  0x5a   : > { %s1020_s13 = scalar_lea.hbm %s1559_s2, 8192  ;;  %p1021_p2 = scmp.lt.u32.totalorder %s1376_s18, %s1559_s2 }
  0x5b   : > { %p1017_p10 = pneg %p1587_p5  ;;  %p1022_p11 = scmp.lt.u32.totalorder %s1020_s13, %s1015_s9 }
  0x5c   : > { %p1024_p13 = scmp.lt.u32.totalorder %s1015_s9, %s1376_s18 }
  0x5d   : > { %p1018_p4 = pnand %p1017_p10, %p1016_p6  ;;  %p1023_p12 = por %p1022_p11, %p1021_p2 }
  0x5f   : > { %p1019_p1 = pneg %p1018_p4  ;;  %p1025_p0 = por %p1024_p13, %p1023_p12 }
  0x61   : > { %p1026_p3 = pnand %p1025_p0, %p1019_p1 }
  0x63   : > { %1029 = shalt.err (!%p1026_p3)
}
  0x64   : > { %s1030_s30 = scalar_lea.vmem %s1378_s7, 4096  ;;  %s1179_s14 = smov [#allocation7]  }
  0x65   : > { %p1031_p8 = scmp.ne.s32.totalorder %s1378_s7, %s1030_s30  ;;  %s1035_s28 = sshll.u32 %s1179_s14, 4  ;;  %s1036_s28 = int_to_ptr.vmem [resolvable:$false] %s1035_s28 }
  0x66   : > { %s1037_s27 = scalar_lea.vmem %s1036_s28, 8192  ;;  %p1038_p6 = scmp.lt.s32.totalorder %s1378_s7, %s1036_s28 }
  0x67   : > { %p1033_p9 = pnand %p1031_p8, %p1017_p10  ;;  %p1039_p4 = scmp.lt.s32.totalorder %s1037_s27, %s1030_s30 }
  0x69   : > { %p1034_p7 = pneg %p1033_p9  ;;  %p1040_p2 = por %p1039_p4, %p1038_p6 }
  0x6b   : > { %p1041_p11 = pnand %p1040_p2, %p1034_p7 }
  0x6d   : > { %1044 = shalt.err (!%p1041_p11)
}
  0x6e   : > { %s1180_s9 = smov 256   ;;  %s1181_s20 = smov 16  }
  0x6f   : > { %850 = dma.hbm_to_vmem [thread:$0]  (!%p1587_p5), %s1376_s18, 4096, %s1378_s7, %s1312_s12, %s1180_s9, %s1180_s9, %s1181_s20  }
  0x70   : > { %p1588_p10 = scmp.ne.s32.totalorder %s1580_s15, 0 }
  0x71   : > { %s285_s13 = sand.u32 (!%p1588_p10), 1, %s1163_s21   ;;  %p1589_p1 = scmp.ne.s32.totalorder (!%p1588_p10), %s1583_s10, 0 }
  0x72   : > { %283 = sbr.rel (%p1588_p10) target bundleno = 670 (0x29e), region = 36  ;;  %s1409_s1 = sshll.u32 (!%p1588_p10), %s285_s13, 3 }
  0x73   : > { %s286_s8 = scalar_lea.sflag (!%p1588_p10), [#allocation3], %s285_s13  ;;  %s289_s30 = scalar_lea.vmem (!%p1588_p10), [#allocation2], %s1409_s1 }
  0x79   : > { %1120 = dma.done.wait (%p1589_p1), %s286_s8, 128  }
  0x7a   : > { %1122 = vsyncadd (%p1589_p1), %s286_s8, 4294967168  ;;  %s294_s11 = sand.u32 1, %s1257_s25   ;;  %s296_s12 = sand.u32 1, %s1155_s19  }
  0x7b   : > { %s1418_s15 = sshll.u32 %s296_s12, 3  ;;  %s295_s18 = scalar_lea.sflag [#allocation6], %s294_s11 }
  0x7c   : > { %s298_s7 = scalar_lea.vmem [#allocation5], %s1418_s15  ;;  %p1590_p5 = scmp.ne.s32.totalorder %s1573_s29, 0 }
  0x7e   : > { %1124 = dma.done.wait (%p1590_p5), %s295_s18, 128  }
  0x7f   : > { %1126 = vsyncadd (%p1590_p5), %s295_s18, 4294967168  ;;  %s305_s14 = sand.u32 1, %s1143_s16   ;;  %p1591_p12 = scmp.ne.s32.totalorder %s1574_s6, 0 }
  0x80   : > { %s757_s10 = sshll.u32 %s305_s14, 8 }
  0x81   : > { %s1426_s28 = scalar_lea.vmem [#allocation7], %s757_s10 }
  0x82   : > { %1128 = dma.done.wait (%p1591_p12), %s295_s18, 4096  }
  0x83   : > { %1130 = vsyncadd (%p1591_p12), %s295_s18, 4294963200  ;;  %p758_p13 = scmp.ne.s32.totalorder %s1167_s22, 0 }
  0x84   : > { %v360_v0 = vlaneseq (!%p758_p13)  ;;  %v358_v2 = vld [vmem:[%s1560_s3] sm:$0x3] (!%p758_p13) }
  0x85   : > { %357 = sbr.rel (%p758_p13) target bundleno = 141 (0x8d), region = 52 }
  0x86   : > { %v361_v1 = vshrl.u32 (!%p758_p13), %v360_v0, 7 }
  0x88   : > { %v362_v3 = vsub.s32 (!%p758_p13), 0, %v361_v1  ;;  %v366_v4 = vsub.s32 (!%p758_p13), 1, %v361_v1 }
  0x8a   : > { %v363_v5 = vrot.slane (!%p758_p13), %v358_v2, %v362_v3  ;;  %v367_v6 = vrot.slane (!%p758_p13), %v358_v2, %v366_v4 }
  0x8c   : > { %370 = vst [vmem:[#allocation8] sm:$0xff] %v363_v5  ;;  %371 = vst [vmem:[#allocation8 + $0x8] sm:$0xff] %v367_v6 }
  0x8d PF: > { %p759_p0 = scmp.ge.s32.totalorder %s1167_s22, 1 }
  0x8e   : > { %v380_v7 = vld [vmem:[%s1426_s28 + $0x8] sm:$0xff] (!%p759_p0)  ;;  %v382_v8 = vld [vmem:[%s1426_s28 + $0x18] sm:$0xff] (!%p759_p0)  ;;  %v379_v9 = vld [vmem:[%s1426_s28] sm:$0xff] (!%p759_p0)  ;;  %v1182_v14 = vmov (!%p759_p0), 0.0  }
  0x8f   : > { %375 = sbr.rel (%p759_p0) target bundleno = 393 (0x189), region = 56  ;;  %v767_v10 = vpack.c.bf16 (!%p759_p0), %v382_v8, %v380_v7  ;;  %v381_v11 = vld [vmem:[%s1426_s28 + $0x10] sm:$0xff] (!%p759_p0)  ;;  %v384_v12 = vld [vmem:[%s1426_s28 + $0x28] sm:$0xff] (!%p759_p0)  ;;  %v386_v13 = vld [vmem:[%s1426_s28 + $0x38] sm:$0xff] (!%p759_p0)  ;;  %475 = vmatprep.mubr.f32.mxu0 (!%p759_p0), %v1182_v14 }
  0x90   : > { %v769_v15 = vpack.c.bf16 (!%p759_p0), %v381_v11, %v379_v9  ;;  %v771_v16 = vpack.c.bf16 (!%p759_p0), %v386_v13, %v384_v12  ;;  %v383_v17 = vld [vmem:[%s1426_s28 + $0x20] sm:$0xff] (!%p759_p0)  ;;  %v385_v18 = vld [vmem:[%s1426_s28 + $0x30] sm:$0xff] (!%p759_p0)  ;;  %v388_v19 = vld [vmem:[%s1426_s28 + $0x48] sm:$0xff] (!%p759_p0) }
  0x91   : > { %768 = vmatprep.subr.bf16.mxu0 (!%p759_p0), %v767_v10  ;;  %v390_v20 = vld [vmem:[%s1426_s28 + $0x58] sm:$0xff] (!%p759_p0)  ;;  %v773_v21 = vpack.c.bf16 (!%p759_p0), %v385_v18, %v383_v17  ;;  %v387_v23 = vld [vmem:[%s1426_s28 + $0x40] sm:$0xff] (!%p759_p0)  ;;  %v389_v24 = vld [vmem:[%s1426_s28 + $0x50] sm:$0xff] (!%p759_p0) }
  0x92   : > { %770 = vmatpush1.bf16.msra.mxu0 (!%p759_p0), %v769_v15  ;;  %v775_v22 = vpack.c.bf16 (!%p759_p0), %v390_v20, %v388_v19  ;;  %v392_v25 = vld [vmem:[%s1426_s28 + $0x68] sm:$0xff] (!%p759_p0)  ;;  %v394_v26 = vld [vmem:[%s1426_s28 + $0x78] sm:$0xff] (!%p759_p0)  ;;  %v777_v27 = vpack.c.bf16 (!%p759_p0), %v389_v24, %v387_v23  ;;  %v391_v29 = vld [vmem:[%s1426_s28 + $0x60] sm:$0xff] (!%p759_p0) }
  0x93   : > { %772 = vmatprep.subr.bf16.mxu0 (!%p759_p0), %v771_v16  ;;  %v779_v28 = vpack.c.bf16 (!%p759_p0), %v394_v26, %v392_v25  ;;  %v393_v30 = vld [vmem:[%s1426_s28 + $0x70] sm:$0xff] (!%p759_p0)  ;;  %v396_v31 = vld [vmem:[%s1426_s28 + $0x88] sm:$0xff] (!%p759_p0)  ;;  %v398_v32 = vld [vmem:[%s1426_s28 + $0x98] sm:$0xff] (!%p759_p0) }
  0x94   : > { %v781_v33 = vpack.c.bf16 (!%p759_p0), %v393_v30, %v391_v29  ;;  %v783_v34 = vpack.c.bf16 (!%p759_p0), %v398_v32, %v396_v31  ;;  %v395_v35 = vld [vmem:[%s1426_s28 + $0x80] sm:$0xff] (!%p759_p0)  ;;  %v397_v36 = vld [vmem:[%s1426_s28 + $0x90] sm:$0xff] (!%p759_p0)  ;;  %v400_v37 = vld [vmem:[%s1426_s28 + $0xa8] sm:$0xff] (!%p759_p0) }
  0x95   : > { %v402_v38 = vld [vmem:[%s1426_s28 + $0xb8] sm:$0xff] (!%p759_p0)  ;;  %v785_v39 = vpack.c.bf16 (!%p759_p0), %v397_v36, %v395_v35  ;;  %v399_v41 = vld [vmem:[%s1426_s28 + $0xa0] sm:$0xff] (!%p759_p0)  ;;  %v401_v42 = vld [vmem:[%s1426_s28 + $0xb0] sm:$0xff] (!%p759_p0) }
  0x96   : > { %774 = vmatpush1.bf16.msra.mxu0 %v773_v21  ;;  %v787_v40 = vpack.c.bf16 %v402_v38, %v400_v37  ;;  %v404_v43 = vld [vmem:[%s1426_s28 + $0xc8] sm:$0xff]  ;;  %v406_v44 = vld [vmem:[%s1426_s28 + $0xd8] sm:$0xff]  ;;  %v789_v45 = vpack.c.bf16 %v401_v42, %v399_v41  ;;  %v403_v47 = vld [vmem:[%s1426_s28 + $0xc0] sm:$0xff] }
  0x97   : > { %776 = vmatprep.subr.bf16.mxu0 %v775_v22  ;;  %v791_v46 = vpack.c.bf16 %v406_v44, %v404_v43  ;;  %v405_v48 = vld [vmem:[%s1426_s28 + $0xd0] sm:$0xff]  ;;  %v408_v49 = vld [vmem:[%s1426_s28 + $0xe8] sm:$0xff]  ;;  %v410_v50 = vld [vmem:[%s1426_s28 + $0xf8] sm:$0xff] }
  0x98   : > { %v793_v51 = vpack.c.bf16 %v405_v48, %v403_v47  ;;  %v795_v52 = vpack.c.bf16 %v410_v50, %v408_v49  ;;  %v407_v53 = vld [vmem:[%s1426_s28 + $0xe0] sm:$0xff]  ;;  %v409_v54 = vld [vmem:[%s1426_s28 + $0xf0] sm:$0xff]  ;;  %v377_v58 = vld [vmem:[#allocation8 + $0x8] sm:$0xff] }
  0x99   : > { %v797_v55 = vpack.c.bf16 %v409_v54, %v407_v53  ;;  %v378_v56 = vld [vmem:[%s289_s30] sm:$0xff] }
  0x9a   : > { %778 = vmatpush1.bf16.msra.mxu0 %v777_v27  ;;  %v376_v57 = vld [vmem:[#allocation8] sm:$0xff] }
  0x9b   : > { %780 = vmatprep.subr.bf16.mxu0 %v779_v28 }
  0x9e   : > { %782 = vmatpush1.bf16.msra.mxu0 %v781_v33 }
  0x9f   : > { %784 = vmatprep.subr.bf16.mxu0 %v783_v34 }
  0xa2   : > { %786 = vmatpush1.bf16.msra.mxu0 %v785_v39 }
  0xa3   : > { %788 = vmatprep.subr.bf16.mxu0 %v787_v40 }
  0xa6   : > { %790 = vmatpush1.bf16.msra.mxu0 %v789_v45 }
  0xa7   : > { %792 = vmatprep.subr.bf16.mxu0 %v791_v46 }
  0xaa   : > { %794 = vmatpush1.bf16.msra.mxu0 %v793_v51 }
  0xab   : > { %796 = vmatprep.subr.bf16.mxu0 %v795_v52 }
  0xae   : > { %798 = vmatpush1.bf16.msra.mxu0 %v797_v55 }
  0xb1   : > { %476 = vmatmul.mubr.f32.vlgmr.msra.gmra.mrb[0].mxu0 %v378_v56 }
 0x184   : > { %v477_v59 = vpop.f32.mrb[0].mxu0 }
 0x185   : > { %v482_v60 = vadd.f32 %v477_v59, %v376_v57  ;;  %v479_v61 = vpop.f32.mrb[1].mxu0 }
 0x186   : > { %v483_v62 = vadd.f32 %v479_v61, %v377_v58 }
 0x187   : > { %484 = vst [vmem:[#allocation8] sm:$0xff] %v482_v60 }
 0x188   : > { %485 = vst [vmem:[#allocation8 + $0x8] sm:$0xff] %v483_v62 }
 0x189 PF: > { %p760_p3 = scmp.lt.s32.totalorder %s1167_s22, 1 }
 0x18a   : > { %v494_v63 = vld [vmem:[%s1426_s28 + $0x8] sm:$0xff] (!%p760_p3)  ;;  %v496_v0 = vld [vmem:[%s1426_s28 + $0x18] sm:$0xff] (!%p760_p3)  ;;  %v493_v1 = vld [vmem:[%s1426_s28] sm:$0xff] (!%p760_p3)  ;;  %v1183_v6 = vmov (!%p760_p3), 0.0  }
 0x18b   : > { %489 = sbr.rel (%p760_p3) target bundleno = 645 (0x285), region = 60  ;;  %v799_v2 = vpack.c.bf16 (!%p760_p3), %v496_v0, %v494_v63  ;;  %v495_v3 = vld [vmem:[%s1426_s28 + $0x10] sm:$0xff] (!%p760_p3)  ;;  %v498_v4 = vld [vmem:[%s1426_s28 + $0x28] sm:$0xff] (!%p760_p3)  ;;  %v500_v5 = vld [vmem:[%s1426_s28 + $0x38] sm:$0xff] (!%p760_p3)  ;;  %589 = vmatprep.mubr.f32.mxu0 (!%p760_p3), %v1183_v6 }
 0x18c   : > { %v801_v7 = vpack.c.bf16 (!%p760_p3), %v495_v3, %v493_v1  ;;  %v803_v8 = vpack.c.bf16 (!%p760_p3), %v500_v5, %v498_v4  ;;  %v497_v9 = vld [vmem:[%s1426_s28 + $0x20] sm:$0xff] (!%p760_p3)  ;;  %v499_v10 = vld [vmem:[%s1426_s28 + $0x30] sm:$0xff] (!%p760_p3)  ;;  %v502_v11 = vld [vmem:[%s1426_s28 + $0x48] sm:$0xff] (!%p760_p3) }
 0x18d   : > { %800 = vmatprep.subr.bf16.mxu0 (!%p760_p3), %v799_v2  ;;  %v504_v12 = vld [vmem:[%s1426_s28 + $0x58] sm:$0xff] (!%p760_p3)  ;;  %v805_v13 = vpack.c.bf16 (!%p760_p3), %v499_v10, %v497_v9  ;;  %v501_v15 = vld [vmem:[%s1426_s28 + $0x40] sm:$0xff] (!%p760_p3)  ;;  %v503_v16 = vld [vmem:[%s1426_s28 + $0x50] sm:$0xff] (!%p760_p3) }
 0x18e   : > { %802 = vmatpush1.bf16.msra.mxu0 (!%p760_p3), %v801_v7  ;;  %v807_v14 = vpack.c.bf16 (!%p760_p3), %v504_v12, %v502_v11  ;;  %v506_v17 = vld [vmem:[%s1426_s28 + $0x68] sm:$0xff] (!%p760_p3)  ;;  %v508_v18 = vld [vmem:[%s1426_s28 + $0x78] sm:$0xff] (!%p760_p3)  ;;  %v809_v19 = vpack.c.bf16 (!%p760_p3), %v503_v16, %v501_v15  ;;  %v505_v21 = vld [vmem:[%s1426_s28 + $0x60] sm:$0xff] (!%p760_p3) }
 0x18f   : > { %804 = vmatprep.subr.bf16.mxu0 (!%p760_p3), %v803_v8  ;;  %v811_v20 = vpack.c.bf16 (!%p760_p3), %v508_v18, %v506_v17  ;;  %v507_v22 = vld [vmem:[%s1426_s28 + $0x70] sm:$0xff] (!%p760_p3)  ;;  %v510_v23 = vld [vmem:[%s1426_s28 + $0x88] sm:$0xff] (!%p760_p3)  ;;  %v512_v24 = vld [vmem:[%s1426_s28 + $0x98] sm:$0xff] (!%p760_p3) }
 0x190   : > { %v813_v25 = vpack.c.bf16 (!%p760_p3), %v507_v22, %v505_v21  ;;  %v815_v26 = vpack.c.bf16 (!%p760_p3), %v512_v24, %v510_v23  ;;  %v509_v27 = vld [vmem:[%s1426_s28 + $0x80] sm:$0xff] (!%p760_p3)  ;;  %v511_v28 = vld [vmem:[%s1426_s28 + $0x90] sm:$0xff] (!%p760_p3)  ;;  %v514_v29 = vld [vmem:[%s1426_s28 + $0xa8] sm:$0xff] (!%p760_p3) }
 0x191   : > { %v516_v30 = vld [vmem:[%s1426_s28 + $0xb8] sm:$0xff] (!%p760_p3)  ;;  %v817_v31 = vpack.c.bf16 (!%p760_p3), %v511_v28, %v509_v27  ;;  %v513_v33 = vld [vmem:[%s1426_s28 + $0xa0] sm:$0xff] (!%p760_p3)  ;;  %v515_v34 = vld [vmem:[%s1426_s28 + $0xb0] sm:$0xff] (!%p760_p3) }
 0x192   : > { %806 = vmatpush1.bf16.msra.mxu0 %v805_v13  ;;  %v819_v32 = vpack.c.bf16 %v516_v30, %v514_v29  ;;  %v518_v35 = vld [vmem:[%s1426_s28 + $0xc8] sm:$0xff]  ;;  %v520_v36 = vld [vmem:[%s1426_s28 + $0xd8] sm:$0xff]  ;;  %v821_v37 = vpack.c.bf16 %v515_v34, %v513_v33  ;;  %v517_v39 = vld [vmem:[%s1426_s28 + $0xc0] sm:$0xff] }
 0x193   : > { %808 = vmatprep.subr.bf16.mxu0 %v807_v14  ;;  %v823_v38 = vpack.c.bf16 %v520_v36, %v518_v35  ;;  %v519_v40 = vld [vmem:[%s1426_s28 + $0xd0] sm:$0xff]  ;;  %v522_v41 = vld [vmem:[%s1426_s28 + $0xe8] sm:$0xff]  ;;  %v524_v42 = vld [vmem:[%s1426_s28 + $0xf8] sm:$0xff] }
 0x194   : > { %v825_v43 = vpack.c.bf16 %v519_v40, %v517_v39  ;;  %v827_v44 = vpack.c.bf16 %v524_v42, %v522_v41  ;;  %v521_v45 = vld [vmem:[%s1426_s28 + $0xe0] sm:$0xff]  ;;  %v523_v46 = vld [vmem:[%s1426_s28 + $0xf0] sm:$0xff]  ;;  %v491_v50 = vld [vmem:[#allocation8 + $0x8] sm:$0xff] }
 0x195   : > { %v829_v47 = vpack.c.bf16 %v523_v46, %v521_v45  ;;  %v492_v48 = vld [vmem:[%s298_s7] sm:$0xff]  ;;  %v490_v49 = vld [vmem:[#allocation8] sm:$0xff] }
 0x196   : > { %810 = vmatpush1.bf16.msra.mxu0 %v809_v19 }
 0x197   : > { %812 = vmatprep.subr.bf16.mxu0 %v811_v20 }
 0x19a   : > { %814 = vmatpush1.bf16.msra.mxu0 %v813_v25 }
 0x19b   : > { %816 = vmatprep.subr.bf16.mxu0 %v815_v26 }
 0x19e   : > { %818 = vmatpush1.bf16.msra.mxu0 %v817_v31 }
 0x19f   : > { %820 = vmatprep.subr.bf16.mxu0 %v819_v32 }
 0x1a2   : > { %822 = vmatpush1.bf16.msra.mxu0 %v821_v37 }
 0x1a3   : > { %824 = vmatprep.subr.bf16.mxu0 %v823_v38 }
 0x1a6   : > { %826 = vmatpush1.bf16.msra.mxu0 %v825_v43 }
 0x1a7   : > { %828 = vmatprep.subr.bf16.mxu0 %v827_v44 }
 0x1aa   : > { %830 = vmatpush1.bf16.msra.mxu0 %v829_v47 }
 0x1ad   : > { %590 = vmatmul.mubr.f32.vlgmr.msra.gmra.mrb[0].mxu0 %v492_v48 }
 0x280   : > { %v591_v51 = vpop.f32.mrb[0].mxu0 }
 0x281   : > { %v596_v52 = vadd.f32 %v591_v51, %v490_v49  ;;  %v593_v53 = vpop.f32.mrb[1].mxu0 }
 0x282   : > { %v597_v54 = vadd.f32 %v593_v53, %v491_v50 }
 0x283   : > { %598 = vst [vmem:[#allocation8] sm:$0xff] %v596_v52 }
 0x284   : > { %599 = vst [vmem:[#allocation8 + $0x8] sm:$0xff] %v597_v54 }
 0x285 PF: > { %p852_p8 = scmp.eq.s32.totalorder %s1257_s25, 1  ;;  %s1184_s22 = smov [#allocation8]  }
 0x286   : > { %s612_s29 = sshll.u32 %s1184_s22, 4  ;;  %s613_s29 = int_to_ptr.vmem [resolvable:$true] %s612_s29 }
 0x287   : > { %s1045_s6 = scalar_lea.vmem %s613_s29, 256  ;;  %p1052_p4 = scmp.lt.s32.totalorder %s613_s29, %s613_s29 }
 0x288   : > { %p1046_p9 = scmp.ne.s32.totalorder %s613_s29, %s1045_s6  ;;  %p1053_p2 = scmp.lt.s32.totalorder %s1045_s6, %s1045_s6 }
 0x28a   : > { %p1047_p7 = pnand %p1046_p9, %p852_p8  ;;  %p1054_p11 = por %p1053_p2, %p1052_p4 }
 0x28c   : > { %p1048_p6 = pneg %p1047_p7 }
 0x28e   : > { %p1055_p10 = pnand %p1054_p11, %p1048_p6 }
 0x290   : > { %1058 = shalt.err (!%p1055_p10)
}
 0x291   : > { %s1059_s1 = scalar_lea.hbm %s1561_s4, 256 }
 0x292   : > { %p1060_p1 = scmp.ne.s32.totalorder %s1561_s4, %s1059_s1  ;;  %p1065_p13 = scmp.lt.u32.totalorder %s1059_s1, %s1561_s4 }
 0x294   : > { %p1061_p5 = pnand %p1060_p1, %p852_p8 }
 0x296   : > { %p1062_p12 = pneg %p1061_p5 }
 0x298   : > { %p1067_p0 = pnand %p1065_p13, %p1062_p12 }
 0x29a   : > { %1070 = shalt.err (!%p1067_p0)
}
 0x29b   : > { %838 = dma.vmem_to_hbm [thread:$0]  (%p852_p8), %s613_s29, 256, %s1561_s4, [#allocation4]  }
 0x29c   : > { %1132 = dma.done.wait (%p852_p8), [#allocation4], 256  }
 0x29d   : > { %1134 = vsyncadd (%p852_p8), [#allocation4], 4294967040 }
 0x29e PF: > { %s21_s24 = sadd.s32 1, %s1175_s24   ;;  %s1592_s15 = smov %s1143_s16 }
 0x29f   : > { %p18_p3 = scmp.ge.s32.totalorder %s21_s24, 4   ;;  %s1593_s16 = smov %s1147_s17 }
 0x2a0   : > { %s1594_s17 = smov %s1284_s5  ;;  %s1595_s18 = smov %s1155_s19 }
 0x2a1   : > { %s1542_s19 = smov 0   ;;  %s1596_s20 = smov %s1163_s21 }
 0x2a2   : > { %s1547_s21 = smov 0   ;;  %s1597_s22 = smov %s1171_s23 }
 0x2a3   : > { %s1598_s23 = smov %s1600_s26  ;;  %20 = sbr.rel (!%p18_p3) target bundleno = 11 (0xb), region = 113 }
 0x2aa   :  { %625 = vsyncpa [#allocation3], 1 }
 0x2ab   :  { %627 = vsyncpa [#allocation3 + $0x1], 1 }
 0x2ac   :  { %628 = vsyncpa [#allocation6], 1 }
 0x2ad   :  { %630 = vsyncpa [#allocation6 + $0x1], 1 }
 0x2ae   :  { %631 = vsyncpa [#allocation4], 1 }
 0x2af   :  { %633 = vsyncpa [#allocation4 + $0x1], 1 }

</bundles_post_ra>
